<compile_context>
chip_gen: v6e
topology: v6e:2x2x1
jax: 0.10.0
libtpu: 0.0.40
codegen_flags: <defaults>
</compile_context>

<pallas_src>
import functools

import jax
import jax.numpy as jnp
from jax.experimental import pallas as pl
from jax.experimental.pallas import tpu as pltpu

_LANES = 128


def _leaky_relu(v):
    # PyTorch nn.LeakyReLU default negative_slope = 0.01
    return jnp.where(v > 0, v, 0.01 * v)


# ---------------------------------------------------------------------------
# Parameter packing: all weights -> one (rows, 128) slab, all bias rows (plus
# the final 1-wide weight, transposed) -> one (rows, 128) table.
# Returns (w_slab, b_tab, cfg) where cfg is a hashable tuple of static ints.
# ---------------------------------------------------------------------------
def pack_params(params, input_size, kernel_size):
    K = kernel_size
    w_mats, b_rows = [], []

    def add_w(mat):
        mat = jnp.asarray(mat, jnp.float32)
        assert mat.ndim == 2 and mat.shape[1] <= _LANES
        off = sum(int(m.shape[0]) for m in w_mats)
        w_mats.append(jnp.pad(mat, ((0, 0), (0, _LANES - mat.shape[1]))))
        return off

    def add_b(vec):
        v = jnp.reshape(jnp.asarray(vec, jnp.float32), (1, -1))
        assert v.shape[1] <= _LANES
        idx = len(b_rows)
        b_rows.append(jnp.pad(v, ((0, 0), (0, _LANES - v.shape[1]))))
        return idx

    levels = []
    c_prev = int(input_size)
    for i, blk in enumerate(params["blocks"]):
        c_out = int(blk["w1"].shape[-1])
        d = 2 ** i
        w1_off = add_w(blk["w1"].reshape(K * c_prev, c_out))
        b1_row = add_b(blk["b1"])
        w2_off = add_w(blk["w2"].reshape(K * c_out, c_out))
        b2_row = add_b(blk["b2"])
        if "wds" in blk:
            ds_off = add_w(blk["wds"])
            bds_row = add_b(blk["bds"])
        else:
            ds_off, bds_row = -1, -1
        levels.append((c_prev, c_out, d, w1_off, w2_off, ds_off,
                       b1_row, b2_row, bds_row))
        c_prev = c_out

    c_last = c_prev
    hid = int(params["w_l1"].shape[-1])
    hid2 = int(params["w_l2"].shape[-1])
    # linear1 split so the kernel never concatenates y1/y2 along lanes.
    w1a_off = add_w(params["w_l1"][:c_last, :])
    w1b_off = add_w(params["w_l1"][c_last:, :])
    wl2_off = add_w(params["w_l2"])
    bl1_row = add_b(params["b_l1"])
    bl2_row = add_b(params["b_l2"])
    w3_row = add_b(params["w_l3"].T)      # (1, hid2) — used as elementwise row
    b3_row = add_b(params["b_l3"])        # scalar in lane 0

    w_slab = jnp.concatenate(w_mats, axis=0)
    b_tab = jnp.concatenate(b_rows, axis=0)
    pad_w = (-w_slab.shape[0]) % 8
    if pad_w:
        w_slab = jnp.pad(w_slab, ((0, pad_w), (0, 0)))
    pad_b = (-b_tab.shape[0]) % 8
    if pad_b:
        b_tab = jnp.pad(b_tab, ((0, pad_b), (0, 0)))

    cfg = (K, tuple(levels),
           (c_last, hid, hid2, w1a_off, w1b_off, wl2_off,
            bl1_row, bl2_row, w3_row, b3_row))
    return w_slab, b_tab, cfg


# ---------------------------------------------------------------------------
# Fused kernel factory (one sample per grid step; both towers stacked in time)
# ---------------------------------------------------------------------------
def _make_kernel(cfg, T):
    K, levels, head = cfg
    (c_last, hid, hid2, w1a_off, w1b_off, wl2_off,
     bl1_row, bl2_row, w3_row, b3_row) = head
    NT = 2 * T  # tower 1 rows [0, T), tower 2 rows [T, 2T)

    def kernel(x_ref, w_ref, b_ref, o_ref):
        # Hoisted row mask helper: rows with (row % T) < s are the first s
        # timesteps of a tower -> causal zero; also zeroes the roll wraparound
        # that would bleed tower-1's tail into tower-2's head.
        row_mod = jax.lax.broadcasted_iota(jnp.int32, (NT, 1), 0) % T

        def causal_conv(h, w_off, c_in, c_out, d, b_row):
            # Accumulator starts from the unshifted tap (k = K-1): no zeros buffer.
            acc = jnp.dot(
                h, w_ref[w_off + (K - 1) * c_in:w_off + K * c_in, :c_out],
                preferred_element_type=jnp.float32)
            for k in range(K - 1):          # tiny & static -> fully unrolled
                s = (K - 1 - k) * d
                if s >= T:                  # tap falls entirely off the sequence
                    continue
                y = jnp.dot(
                    h, w_ref[w_off + k * c_in:w_off + (k + 1) * c_in, :c_out],
                    preferred_element_type=jnp.float32)
                # Causal right-shift by s: XLU roll + one VPU select.
                y = pltpu.roll(y, shift=s, axis=0)
                acc = acc + jnp.where(row_mod < s, 0.0, y)
            return acc + b_ref[b_row:b_row + 1, :c_out]

        # ---- TCN over both towers at once (shared weights), flat (2T, c) ----
        h = x_ref[0]                                          # (2T, c0)
        for (c_in, c_out, d, w1_off, w2_off, ds_off,
             b1_row, b2_row, bds_row) in levels:
            a = jnp.maximum(causal_conv(h, w1_off, c_in, c_out, d, b1_row), 0.0)
            z = jnp.maximum(causal_conv(a, w2_off, c_out, c_out, d, b2_row), 0.0)
            if ds_off >= 0:                                   # 1x1 downsample conv
                res = (jnp.dot(h, w_ref[ds_off:ds_off + c_in, :c_out],
                               preferred_element_type=jnp.float32)
                       + b_ref[bds_row:bds_row + 1, :c_out])
            else:
                res = h                                       # true identity skip
            h = jnp.maximum(z + res, 0.0)

        # ---- last timestep per tower + fused MLP head ------------------------
        y1 = h[T - 1:T, :]                                    # (1, c_last) tower 1
        y2 = h[NT - 1:NT, :]                                  # (1, c_last) tower 2
        g = _leaky_relu(
            jnp.dot(y1, w_ref[w1a_off:w1a_off + c_last, :hid],
                    preferred_element_type=jnp.float32)
            + jnp.dot(y2, w_ref[w1b_off:w1b_off + c_last, :hid],
                      preferred_element_type=jnp.float32)
            + b_ref[bl1_row:bl1_row + 1, :hid])
        g = _leaky_relu(
            jnp.dot(g, w_ref[wl2_off:wl2_off + hid, :hid2],
                    preferred_element_type=jnp.float32)
            + b_ref[bl2_row:bl2_row + 1, :hid2])
        # Final (hid2 -> 1): elementwise multiply + lane reduce (no 1-lane MXU dot).
        out = (jnp.sum(g * b_ref[w3_row:w3_row + 1, :hid2], axis=-1, keepdims=True)
               + b_ref[b3_row:b3_row + 1, 0:1])
        out = _leaky_relu(out)
        # Aligned lane/sublane-padded output block (unmasked stores); wrapper slices.
        o_ref[...] = jnp.broadcast_to(out.reshape(1, 1, 1), (1, 8, _LANES))

    return kernel


# ---------------------------------------------------------------------------
# Full forward pass (mirrors TimeSlicePre.forward)
# ---------------------------------------------------------------------------
@functools.partial(jax.jit, static_argnames=("cfg",))
def time_slice_pre_forward(x1_nct, x2_nct, w_slab, b_tab, *, cfg):
    B, C, T = x1_nct.shape
    # NCL -> channels-last; both towers of a sample stacked along time: (B, 2T, C).
    x = jnp.stack([x1_nct, x2_nct], axis=1)                   # (B, 2, C, T)
    x = jnp.transpose(x, (0, 1, 3, 2)).astype(jnp.float32)    # (B, 2, T, C)
    x = x.reshape(B, 2 * T, C)

    kernel = _make_kernel(cfg, T)
    rw, rb = w_slab.shape[0], b_tab.shape[0]
    out = pl.pallas_call(
        kernel,
        grid=(B,),
        in_specs=[
            pl.BlockSpec((1, 2 * T, C), lambda b: (b, 0, 0)),
            pl.BlockSpec((rw, _LANES), lambda b: (0, 0)),     # weights: VMEM-resident
            pl.BlockSpec((rb, _LANES), lambda b: (0, 0)),     # biases:  VMEM-resident
        ],
        out_specs=pl.BlockSpec((1, 8, _LANES), lambda b: (b, 0, 0)),
        out_shape=jax.ShapeDtypeStruct((B, 8, _LANES), jnp.float32),
        compiler_params=pltpu.CompilerParams(
            dimension_semantics=("parallel",)),               # v7x: shard B over 2 TCs
    )(x, w_slab, b_tab)
    return out[:, 0, :1]                                      # (B, 1)


# ---------------------------------------------------------------------------
# Deterministic synthetic parameter init (shapes per module __init__)
# ---------------------------------------------------------------------------
def init_params(key, input_size, num_channels, kernel_size, mlp_hid_size):
    def nrm(k, shape, scale=0.1):
        return scale * jax.random.normal(k, shape, jnp.float32)

    keys = iter(jax.random.split(key, 64))
    blocks = []
    c_prev = input_size
    for c_out in num_channels:
        blk = {
            "w1": nrm(next(keys), (kernel_size, c_prev, c_out)),
            "b1": nrm(next(keys), (1, c_out)),
            "w2": nrm(next(keys), (kernel_size, c_out, c_out)),
            "b2": nrm(next(keys), (1, c_out)),
        }
        if c_prev != c_out:  # PyTorch: 1x1 downsample conv only when needed
            blk["wds"] = nrm(next(keys), (c_prev, c_out))
            blk["bds"] = nrm(next(keys), (1, c_out))
        blocks.append(blk)
        c_prev = c_out

    c_last = num_channels[-1]
    return {
        "blocks": blocks,
        "w_l1": nrm(next(keys), (2 * c_last, mlp_hid_size)),
        "b_l1": nrm(next(keys), (1, mlp_hid_size)),
        "w_l2": nrm(next(keys), (mlp_hid_size, mlp_hid_size // 2)),
        "b_l2": nrm(next(keys), (1, mlp_hid_size // 2)),
        "w_l3": nrm(next(keys), (mlp_hid_size // 2, 1)),
        "b_l3": nrm(next(keys), (1, 1)),
    }


# ---------------------------------------------------------------------------
# Pure-JAX (non-Pallas) reference of TimeSlicePre.forward, for validation
# ---------------------------------------------------------------------------
def time_slice_pre_reference(x1_nct, x2_nct, params, kernel_size):
    K = kernel_size

    def tcn_last(x_nct):
        h = jnp.transpose(x_nct, (0, 2, 1)).astype(jnp.float32)   # (B, T, C)
        B, T, _ = h.shape
        for i, blk in enumerate(params["blocks"]):
            d = 2 ** i
            c_out = blk["w1"].shape[-1]

            def conv(hh, w, b):
                acc = jnp.zeros((B, T, c_out), jnp.float32)
                for k in range(K):
                    s = (K - 1 - k) * d
                    if s >= T:
                        continue
                    y = jnp.einsum("btc,cf->btf", hh, w[k])
                    if s > 0:
                        y = jnp.concatenate(
                            [jnp.zeros((B, s, c_out), jnp.float32),
                             y[:, :T - s, :]], axis=1)
                    acc = acc + y
                return acc + b

            a = jnp.maximum(conv(h, blk["w1"], blk["b1"]), 0.0)
            z = jnp.maximum(conv(a, blk["w2"], blk["b2"]), 0.0)
            if "wds" in blk:
                res = jnp.einsum("btc,cf->btf", h, blk["wds"]) + blk["bds"]
            else:
                res = h
            h = jnp.maximum(z + res, 0.0)
        return h[:, -1, :]

    yc = jnp.concatenate([tcn_last(x1_nct), tcn_last(x2_nct)], axis=1)
    g = _leaky_relu(yc @ params["w_l1"] + params["b_l1"])
    g = _leaky_relu(g @ params["w_l2"] + params["b_l2"])
    g = _leaky_relu(g @ params["w_l3"] + params["b_l3"])
    return g


if __name__ == "__main__":
    B, input_size, T = 2, 4, 16
    num_channels = [8, 8]        # two TCN levels, dilations 1 and 2
    kernel_size = 3
    mlp_hid_size = 32

    root = jax.random.PRNGKey(0)
    k_params, k_x1, k_x2 = jax.random.split(root, 3)
    params = init_params(k_params, input_size, num_channels, kernel_size,
                         mlp_hid_size)

    # PyTorch-style NCL inputs (B, C, T).
    x1 = jax.random.normal(k_x1, (B, input_size, T), jnp.float32)
    x2 = jax.random.normal(k_x2, (B, input_size, T), jnp.float32)

    # Pack once (per review: cuts kernel input DMAs from ~17 to 3).
    w_slab, b_tab, cfg = pack_params(params, input_size, kernel_size)

    out = time_slice_pre_forward(x1, x2, w_slab, b_tab, cfg=cfg)
    out = jax.block_until_ready(out)
    assert out.shape == (B, 1) and out.dtype == jnp.float32

    # Validate against the pure-JAX reference (loose tol for TPU matmul precision;
    # structural bugs — wrong roll direction / packing offsets — are far larger).
    ref = time_slice_pre_reference(x1, x2, params, kernel_size)
    if not jnp.allclose(out, ref, rtol=5e-2, atol=5e-3):
        raise AssertionError(f"Pallas/reference mismatch:\n{out}\nvs\n{ref}")

    print("KERNEL_OK")
</pallas_src>

<mosaic_0001>
module attributes {stable_mosaic.version = 11 : i64} {
  func.func @kernel(%arg0: i32, %arg1: memref<1x32x4xf32, #tpu.memory_space<vmem>>, %arg2: memref<136x128xf32, #tpu.memory_space<vmem>>, %arg3: memref<16x128xf32, #tpu.memory_space<vmem>>, %arg4: memref<1x8x128xf32, #tpu.memory_space<vmem>>) attributes {dimension_semantics = [#tpu.dimension_semantics<parallel>], iteration_bounds = array<i64: 2>, scalar_prefetch = 0 : i64, scratch_operands = 0 : i64, tpu.core_type = #tpu.core_type<tc>, window_params = [{transform_indices = @transform_0, window_bounds = array<i64: 1, 32, 4>}, {pipeline_mode = #tpu.pipeline_mode<synchronous>, transform_indices = @transform_1, window_bounds = array<i64: 136, 128>}, {pipeline_mode = #tpu.pipeline_mode<synchronous>, transform_indices = @transform_2, window_bounds = array<i64: 16, 128>}, {transform_indices = @transform_3, window_bounds = array<i64: 1, 8, 128>}]} {
    %0 = tpu.iota {dimensions = array<i32: 0>} : vector<32x1xi32>
    %c16_i32 = arith.constant 16 : i32
    %c0_i32 = arith.constant 0 : i32
    %1 = arith.cmpi eq, %c16_i32, %c0_i32 : i32
    %c1_i32 = arith.constant 1 : i32
    %2 = arith.select %1, %c1_i32, %c16_i32 : i32
    %3 = vector.broadcast %2 : i32 to vector<32x1xi32>
    %4 = arith.remsi %0, %3 : vector<32x1xi32>
    %c0_i32_0 = arith.constant 0 : i32
    %5 = vector.broadcast %c0_i32_0 : i32 to vector<32x1xi32>
    %6 = arith.cmpi ne, %4, %5 : vector<32x1xi32>
    %c0_i32_1 = arith.constant 0 : i32
    %7 = vector.broadcast %c0_i32_1 : i32 to vector<32x1xi32>
    %8 = arith.cmpi slt, %4, %7 : vector<32x1xi32>
    %c0_i32_2 = arith.constant 0 : i32
    %9 = arith.cmpi slt, %2, %c0_i32_2 : i32
    %10 = vector.broadcast %9 : i1 to vector<32x1xi1>
    %11 = vector.broadcast %10 : vector<32x1xi1> to vector<32x1xi1>
    %12 = arith.xori %8, %11 : vector<32x1xi1>
    %13 = arith.andi %12, %6 : vector<32x1xi1>
    %14 = vector.broadcast %2 : i32 to vector<32x1xi32>
    %15 = arith.addi %4, %14 : vector<32x1xi32>
    %16 = arith.select %13, %15, %4 : vector<32x1xi1>, vector<32x1xi32>
    %c0 = arith.constant 0 : index
    %c0_3 = arith.constant 0 : index
    %c0_4 = arith.constant 0 : index
    %17 = vector.load %arg1[%c0, %c0_3, %c0_4] : memref<1x32x4xf32, #tpu.memory_space<vmem>>, vector<1x32x4xf32>
    %18 = vector.shape_cast %17 : vector<1x32x4xf32> to vector<32x4xf32>
    %c8 = arith.constant 8 : index
    %c0_5 = arith.constant 0 : index
    %19 = vector.load %arg2[%c8, %c0_5] : memref<136x128xf32, #tpu.memory_space<vmem>>, vector<4x8xf32>
    %cst = arith.constant dense<0.000000e+00> : vector<32x8xf32>
    %20 = tpu.matmul %18, %19, %cst {dimension_numbers = #tpu.dot_dimension_numbers<[1], [0], [0], [1], [0, 0, 1, 1], [], []>} : vector<32x4xf32>, vector<4x8xf32>, vector<32x8xf32> -> vector<32x8xf32>
    %c0_6 = arith.constant 0 : index
    %c0_7 = arith.constant 0 : index
    %21 = vector.load %arg2[%c0_6, %c0_7] : memref<136x128xf32, #tpu.memory_space<vmem>>, vector<4x8xf32>
    %cst_8 = arith.constant dense<0.000000e+00> : vector<32x8xf32>
    %22 = tpu.matmul %18, %21, %cst_8 {dimension_numbers = #tpu.dot_dimension_numbers<[1], [0], [0], [1], [0, 0, 1, 1], [], []>} : vector<32x4xf32>, vector<4x8xf32>, vector<32x8xf32> -> vector<32x8xf32>
    %c2_i32 = arith.constant 2 : i32
    %23 = tpu.dynamic_rotate %22 by %c2_i32 dim 0 : vector<32x8xf32>, i32 -> vector<32x8xf32>
    %c2_i32_9 = arith.constant 2 : i32
    %24 = vector.broadcast %c2_i32_9 : i32 to vector<32x1xi32>
    %25 = arith.cmpi slt, %16, %24 : vector<32x1xi32>
    %cst_10 = arith.constant 0.000000e+00 : f32
    %26 = vector.shape_cast %25 : vector<32x1xi1> to vector<32x1xi1>
    %27 = vector.broadcast %26 : vector<32x1xi1> to vector<32x8xi1>
    %28 = vector.broadcast %cst_10 : f32 to vector<32x8xf32>
    %29 = arith.select %27, %28, %23 : vector<32x8xi1>, vector<32x8xf32>
    %30 = arith.addf %20, %29 : vector<32x8xf32>
    %c4 = arith.constant 4 : index
    %c0_11 = arith.constant 0 : index
    %31 = vector.load %arg2[%c4, %c0_11] : memref<136x128xf32, #tpu.memory_space<vmem>>, vector<4x8xf32>
    %cst_12 = arith.constant dense<0.000000e+00> : vector<32x8xf32>
    %32 = tpu.matmul %18, %31, %cst_12 {dimension_numbers = #tpu.dot_dimension_numbers<[1], [0], [0], [1], [0, 0, 1, 1], [], []>} : vector<32x4xf32>, vector<4x8xf32>, vector<32x8xf32> -> vector<32x8xf32>
    %c1_i32_13 = arith.constant 1 : i32
    %33 = tpu.dynamic_rotate %32 by %c1_i32_13 dim 0 : vector<32x8xf32>, i32 -> vector<32x8xf32>
    %c1_i32_14 = arith.constant 1 : i32
    %34 = vector.broadcast %c1_i32_14 : i32 to vector<32x1xi32>
    %35 = arith.cmpi slt, %16, %34 : vector<32x1xi32>
    %cst_15 = arith.constant 0.000000e+00 : f32
    %36 = vector.shape_cast %35 : vector<32x1xi1> to vector<32x1xi1>
    %37 = vector.broadcast %36 : vector<32x1xi1> to vector<32x8xi1>
    %38 = vector.broadcast %cst_15 : f32 to vector<32x8xf32>
    %39 = arith.select %37, %38, %33 : vector<32x8xi1>, vector<32x8xf32>
    %40 = arith.addf %30, %39 : vector<32x8xf32>
    %c0_16 = arith.constant 0 : index
    %c0_17 = arith.constant 0 : index
    %41 = vector.load %arg3[%c0_16, %c0_17] : memref<16x128xf32, #tpu.memory_space<vmem>>, vector<1x8xf32>
    %42 = vector.broadcast %41 : vector<1x8xf32> to vector<32x8xf32>
    %43 = arith.addf %40, %42 : vector<32x8xf32>
    %cst_18 = arith.constant 0.000000e+00 : f32
    %44 = vector.broadcast %cst_18 : f32 to vector<32x8xf32>
    %45 = arith.maximumf %43, %44 : vector<32x8xf32>
    %c28 = arith.constant 28 : index
    %c0_19 = arith.constant 0 : index
    %46 = vector.load %arg2[%c28, %c0_19] : memref<136x128xf32, #tpu.memory_space<vmem>>, vector<8x8xf32>
    %cst_20 = arith.constant dense<0.000000e+00> : vector<32x8xf32>
    %47 = tpu.matmul %45, %46, %cst_20 {dimension_numbers = #tpu.dot_dimension_numbers<[1], [0], [0], [1], [0, 0, 1, 1], [], []>} : vector<32x8xf32>, vector<8x8xf32>, vector<32x8xf32> -> vector<32x8xf32>
    %c12 = arith.constant 12 : index
    %c0_21 = arith.constant 0 : index
    %48 = vector.load %arg2[%c12, %c0_21] : memref<136x128xf32, #tpu.memory_space<vmem>>, vector<8x8xf32>
    %cst_22 = arith.constant dense<0.000000e+00> : vector<32x8xf32>
    %49 = tpu.matmul %45, %48, %cst_22 {dimension_numbers = #tpu.dot_dimension_numbers<[1], [0], [0], [1], [0, 0, 1, 1], [], []>} : vector<32x8xf32>, vector<8x8xf32>, vector<32x8xf32> -> vector<32x8xf32>
    %c2_i32_23 = arith.constant 2 : i32
    %50 = tpu.dynamic_rotate %49 by %c2_i32_23 dim 0 : vector<32x8xf32>, i32 -> vector<32x8xf32>
    %c2_i32_24 = arith.constant 2 : i32
    %51 = vector.broadcast %c2_i32_24 : i32 to vector<32x1xi32>
    %52 = arith.cmpi slt, %16, %51 : vector<32x1xi32>
    %cst_25 = arith.constant 0.000000e+00 : f32
    %53 = vector.shape_cast %52 : vector<32x1xi1> to vector<32x1xi1>
    %54 = vector.broadcast %53 : vector<32x1xi1> to vector<32x8xi1>
    %55 = vector.broadcast %cst_25 : f32 to vector<32x8xf32>
    %56 = arith.select %54, %55, %50 : vector<32x8xi1>, vector<32x8xf32>
    %57 = arith.addf %47, %56 : vector<32x8xf32>
    %c20 = arith.constant 20 : index
    %c0_26 = arith.constant 0 : index
    %58 = vector.load %arg2[%c20, %c0_26] : memref<136x128xf32, #tpu.memory_space<vmem>>, vector<8x8xf32>
    %cst_27 = arith.constant dense<0.000000e+00> : vector<32x8xf32>
    %59 = tpu.matmul %45, %58, %cst_27 {dimension_numbers = #tpu.dot_dimension_numbers<[1], [0], [0], [1], [0, 0, 1, 1], [], []>} : vector<32x8xf32>, vector<8x8xf32>, vector<32x8xf32> -> vector<32x8xf32>
    %c1_i32_28 = arith.constant 1 : i32
    %60 = tpu.dynamic_rotate %59 by %c1_i32_28 dim 0 : vector<32x8xf32>, i32 -> vector<32x8xf32>
    %c1_i32_29 = arith.constant 1 : i32
    %61 = vector.broadcast %c1_i32_29 : i32 to vector<32x1xi32>
    %62 = arith.cmpi slt, %16, %61 : vector<32x1xi32>
    %cst_30 = arith.constant 0.000000e+00 : f32
    %63 = vector.shape_cast %62 : vector<32x1xi1> to vector<32x1xi1>
    %64 = vector.broadcast %63 : vector<32x1xi1> to vector<32x8xi1>
    %65 = vector.broadcast %cst_30 : f32 to vector<32x8xf32>
    %66 = arith.select %64, %65, %60 : vector<32x8xi1>, vector<32x8xf32>
    %67 = arith.addf %57, %66 : vector<32x8xf32>
    %c1 = arith.constant 1 : index
    %c0_31 = arith.constant 0 : index
    %68 = vector.load %arg3[%c1, %c0_31] : memref<16x128xf32, #tpu.memory_space<vmem>>, vector<1x8xf32>
    %69 = vector.broadcast %68 : vector<1x8xf32> to vector<32x8xf32>
    %70 = arith.addf %67, %69 : vector<32x8xf32>
    %cst_32 = arith.constant 0.000000e+00 : f32
    %71 = vector.broadcast %cst_32 : f32 to vector<32x8xf32>
    %72 = arith.maximumf %70, %71 : vector<32x8xf32>
    %c36 = arith.constant 36 : index
    %c0_33 = arith.constant 0 : index
    %73 = vector.load %arg2[%c36, %c0_33] : memref<136x128xf32, #tpu.memory_space<vmem>>, vector<4x8xf32>
    %cst_34 = arith.constant dense<0.000000e+00> : vector<32x8xf32>
    %74 = tpu.matmul %18, %73, %cst_34 {dimension_numbers = #tpu.dot_dimension_numbers<[1], [0], [0], [1], [0, 0, 1, 1], [], []>} : vector<32x4xf32>, vector<4x8xf32>, vector<32x8xf32> -> vector<32x8xf32>
    %c2 = arith.constant 2 : index
    %c0_35 = arith.constant 0 : index
    %75 = vector.load %arg3[%c2, %c0_35] : memref<16x128xf32, #tpu.memory_space<vmem>>, vector<1x8xf32>
    %76 = vector.broadcast %75 : vector<1x8xf32> to vector<32x8xf32>
    %77 = arith.addf %74, %76 : vector<32x8xf32>
    %78 = arith.addf %72, %77 : vector<32x8xf32>
    %cst_36 = arith.constant 0.000000e+00 : f32
    %79 = vector.broadcast %cst_36 : f32 to vector<32x8xf32>
    %80 = arith.maximumf %78, %79 : vector<32x8xf32>
    %c56 = arith.constant 56 : index
    %c0_37 = arith.constant 0 : index
    %81 = vector.load %arg2[%c56, %c0_37] : memref<136x128xf32, #tpu.memory_space<vmem>>, vector<8x8xf32>
    %cst_38 = arith.constant dense<0.000000e+00> : vector<32x8xf32>
    %82 = tpu.matmul %80, %81, %cst_38 {dimension_numbers = #tpu.dot_dimension_numbers<[1], [0], [0], [1], [0, 0, 1, 1], [], []>} : vector<32x8xf32>, vector<8x8xf32>, vector<32x8xf32> -> vector<32x8xf32>
    %c40 = arith.constant 40 : index
    %c0_39 = arith.constant 0 : index
    %83 = vector.load %arg2[%c40, %c0_39] : memref<136x128xf32, #tpu.memory_space<vmem>>, vector<8x8xf32>
    %cst_40 = arith.constant dense<0.000000e+00> : vector<32x8xf32>
    %84 = tpu.matmul %80, %83, %cst_40 {dimension_numbers = #tpu.dot_dimension_numbers<[1], [0], [0], [1], [0, 0, 1, 1], [], []>} : vector<32x8xf32>, vector<8x8xf32>, vector<32x8xf32> -> vector<32x8xf32>
    %c4_i32 = arith.constant 4 : i32
    %85 = tpu.dynamic_rotate %84 by %c4_i32 dim 0 : vector<32x8xf32>, i32 -> vector<32x8xf32>
    %c4_i32_41 = arith.constant 4 : i32
    %86 = vector.broadcast %c4_i32_41 : i32 to vector<32x1xi32>
    %87 = arith.cmpi slt, %16, %86 : vector<32x1xi32>
    %cst_42 = arith.constant 0.000000e+00 : f32
    %88 = vector.shape_cast %87 : vector<32x1xi1> to vector<32x1xi1>
    %89 = vector.broadcast %88 : vector<32x1xi1> to vector<32x8xi1>
    %90 = vector.broadcast %cst_42 : f32 to vector<32x8xf32>
    %91 = arith.select %89, %90, %85 : vector<32x8xi1>, vector<32x8xf32>
    %92 = arith.addf %82, %91 : vector<32x8xf32>
    %c48 = arith.constant 48 : index
    %c0_43 = arith.constant 0 : index
    %93 = vector.load %arg2[%c48, %c0_43] : memref<136x128xf32, #tpu.memory_space<vmem>>, vector<8x8xf32>
    %cst_44 = arith.constant dense<0.000000e+00> : vector<32x8xf32>
    %94 = tpu.matmul %80, %93, %cst_44 {dimension_numbers = #tpu.dot_dimension_numbers<[1], [0], [0], [1], [0, 0, 1, 1], [], []>} : vector<32x8xf32>, vector<8x8xf32>, vector<32x8xf32> -> vector<32x8xf32>
    %c2_i32_45 = arith.constant 2 : i32
    %95 = tpu.dynamic_rotate %94 by %c2_i32_45 dim 0 : vector<32x8xf32>, i32 -> vector<32x8xf32>
    %c2_i32_46 = arith.constant 2 : i32
    %96 = vector.broadcast %c2_i32_46 : i32 to vector<32x1xi32>
    %97 = arith.cmpi slt, %16, %96 : vector<32x1xi32>
    %cst_47 = arith.constant 0.000000e+00 : f32
    %98 = vector.shape_cast %97 : vector<32x1xi1> to vector<32x1xi1>
    %99 = vector.broadcast %98 : vector<32x1xi1> to vector<32x8xi1>
    %100 = vector.broadcast %cst_47 : f32 to vector<32x8xf32>
    %101 = arith.select %99, %100, %95 : vector<32x8xi1>, vector<32x8xf32>
    %102 = arith.addf %92, %101 : vector<32x8xf32>
    %c3 = arith.constant 3 : index
    %c0_48 = arith.constant 0 : index
    %103 = vector.load %arg3[%c3, %c0_48] : memref<16x128xf32, #tpu.memory_space<vmem>>, vector<1x8xf32>
    %104 = vector.broadcast %103 : vector<1x8xf32> to vector<32x8xf32>
    %105 = arith.addf %102, %104 : vector<32x8xf32>
    %cst_49 = arith.constant 0.000000e+00 : f32
    %106 = vector.broadcast %cst_49 : f32 to vector<32x8xf32>
    %107 = arith.maximumf %105, %106 : vector<32x8xf32>
    %c80 = arith.constant 80 : index
    %c0_50 = arith.constant 0 : index
    %108 = vector.load %arg2[%c80, %c0_50] : memref<136x128xf32, #tpu.memory_space<vmem>>, vector<8x8xf32>
    %cst_51 = arith.constant dense<0.000000e+00> : vector<32x8xf32>
    %109 = tpu.matmul %107, %108, %cst_51 {dimension_numbers = #tpu.dot_dimension_numbers<[1], [0], [0], [1], [0, 0, 1, 1], [], []>} : vector<32x8xf32>, vector<8x8xf32>, vector<32x8xf32> -> vector<32x8xf32>
    %c64 = arith.constant 64 : index
    %c0_52 = arith.constant 0 : index
    %110 = vector.load %arg2[%c64, %c0_52] : memref<136x128xf32, #tpu.memory_space<vmem>>, vector<8x8xf32>
    %cst_53 = arith.constant dense<0.000000e+00> : vector<32x8xf32>
    %111 = tpu.matmul %107, %110, %cst_53 {dimension_numbers = #tpu.dot_dimension_numbers<[1], [0], [0], [1], [0, 0, 1, 1], [], []>} : vector<32x8xf32>, vector<8x8xf32>, vector<32x8xf32> -> vector<32x8xf32>
    %c4_i32_54 = arith.constant 4 : i32
    %112 = tpu.dynamic_rotate %111 by %c4_i32_54 dim 0 : vector<32x8xf32>, i32 -> vector<32x8xf32>
    %c4_i32_55 = arith.constant 4 : i32
    %113 = vector.broadcast %c4_i32_55 : i32 to vector<32x1xi32>
    %114 = arith.cmpi slt, %16, %113 : vector<32x1xi32>
    %cst_56 = arith.constant 0.000000e+00 : f32
    %115 = vector.shape_cast %114 : vector<32x1xi1> to vector<32x1xi1>
    %116 = vector.broadcast %115 : vector<32x1xi1> to vector<32x8xi1>
    %117 = vector.broadcast %cst_56 : f32 to vector<32x8xf32>
    %118 = arith.select %116, %117, %112 : vector<32x8xi1>, vector<32x8xf32>
    %119 = arith.addf %109, %118 : vector<32x8xf32>
    %c72 = arith.constant 72 : index
    %c0_57 = arith.constant 0 : index
    %120 = vector.load %arg2[%c72, %c0_57] : memref<136x128xf32, #tpu.memory_space<vmem>>, vector<8x8xf32>
    %cst_58 = arith.constant dense<0.000000e+00> : vector<32x8xf32>
    %121 = tpu.matmul %107, %120, %cst_58 {dimension_numbers = #tpu.dot_dimension_numbers<[1], [0], [0], [1], [0, 0, 1, 1], [], []>} : vector<32x8xf32>, vector<8x8xf32>, vector<32x8xf32> -> vector<32x8xf32>
    %c2_i32_59 = arith.constant 2 : i32
    %122 = tpu.dynamic_rotate %121 by %c2_i32_59 dim 0 : vector<32x8xf32>, i32 -> vector<32x8xf32>
    %c2_i32_60 = arith.constant 2 : i32
    %123 = vector.broadcast %c2_i32_60 : i32 to vector<32x1xi32>
    %124 = arith.cmpi slt, %16, %123 : vector<32x1xi32>
    %cst_61 = arith.constant 0.000000e+00 : f32
    %125 = vector.shape_cast %124 : vector<32x1xi1> to vector<32x1xi1>
    %126 = vector.broadcast %125 : vector<32x1xi1> to vector<32x8xi1>
    %127 = vector.broadcast %cst_61 : f32 to vector<32x8xf32>
    %128 = arith.select %126, %127, %122 : vector<32x8xi1>, vector<32x8xf32>
    %129 = arith.addf %119, %128 : vector<32x8xf32>
    %c4_62 = arith.constant 4 : index
    %c0_63 = arith.constant 0 : index
    %130 = vector.load %arg3[%c4_62, %c0_63] : memref<16x128xf32, #tpu.memory_space<vmem>>, vector<1x8xf32>
    %131 = vector.broadcast %130 : vector<1x8xf32> to vector<32x8xf32>
    %132 = arith.addf %129, %131 : vector<32x8xf32>
    %cst_64 = arith.constant 0.000000e+00 : f32
    %133 = vector.broadcast %cst_64 : f32 to vector<32x8xf32>
    %134 = arith.maximumf %132, %133 : vector<32x8xf32>
    %135 = arith.addf %134, %80 : vector<32x8xf32>
    %cst_65 = arith.constant 0.000000e+00 : f32
    %136 = vector.broadcast %cst_65 : f32 to vector<32x8xf32>
    %137 = arith.maximumf %135, %136 : vector<32x8xf32>
    %138 = vector.extract_strided_slice %137 {offsets = [15, 0], sizes = [1, 8], strides = [1, 1]} : vector<32x8xf32> to vector<1x8xf32>
    %139 = vector.extract_strided_slice %137 {offsets = [31, 0], sizes = [1, 8], strides = [1, 1]} : vector<32x8xf32> to vector<1x8xf32>
    %c88 = arith.constant 88 : index
    %c0_66 = arith.constant 0 : index
    %140 = vector.load %arg2[%c88, %c0_66] : memref<136x128xf32, #tpu.memory_space<vmem>>, vector<8x32xf32>
    %cst_67 = arith.constant dense<0.000000e+00> : vector<1x32xf32>
    %141 = tpu.matmul %138, %140, %cst_67 {dimension_numbers = #tpu.dot_dimension_numbers<[1], [0], [0], [1], [0, 0, 1, 1], [], []>} : vector<1x8xf32>, vector<8x32xf32>, vector<1x32xf32> -> vector<1x32xf32>
    %c96 = arith.constant 96 : index
    %c0_68 = arith.constant 0 : index
    %142 = vector.load %arg2[%c96, %c0_68] : memref<136x128xf32, #tpu.memory_space<vmem>>, vector<8x32xf32>
    %cst_69 = arith.constant dense<0.000000e+00> : vector<1x32xf32>
    %143 = tpu.matmul %139, %142, %cst_69 {dimension_numbers = #tpu.dot_dimension_numbers<[1], [0], [0], [1], [0, 0, 1, 1], [], []>} : vector<1x8xf32>, vector<8x32xf32>, vector<1x32xf32> -> vector<1x32xf32>
    %144 = arith.addf %141, %143 : vector<1x32xf32>
    %c5 = arith.constant 5 : index
    %c0_70 = arith.constant 0 : index
    %145 = vector.load %arg3[%c5, %c0_70] : memref<16x128xf32, #tpu.memory_space<vmem>>, vector<1x32xf32>
    %146 = arith.addf %144, %145 : vector<1x32xf32>
    %cst_71 = arith.constant 0.000000e+00 : f32
    %147 = vector.broadcast %cst_71 : f32 to vector<1x32xf32>
    %148 = arith.cmpf ogt, %146, %147 : vector<1x32xf32>
    %cst_72 = arith.constant 0.00999999977 : f32
    %149 = vector.broadcast %cst_72 : f32 to vector<1x32xf32>
    %150 = arith.mulf %149, %146 : vector<1x32xf32>
    %151 = arith.select %148, %146, %150 : vector<1x32xi1>, vector<1x32xf32>
    %c104 = arith.constant 104 : index
    %c0_73 = arith.constant 0 : index
    %152 = vector.load %arg2[%c104, %c0_73] : memref<136x128xf32, #tpu.memory_space<vmem>>, vector<32x16xf32>
    %cst_74 = arith.constant dense<0.000000e+00> : vector<1x16xf32>
    %153 = tpu.matmul %151, %152, %cst_74 {dimension_numbers = #tpu.dot_dimension_numbers<[1], [0], [0], [1], [0, 0, 1, 1], [], []>} : vector<1x32xf32>, vector<32x16xf32>, vector<1x16xf32> -> vector<1x16xf32>
    %c6 = arith.constant 6 : index
    %c0_75 = arith.constant 0 : index
    %154 = vector.load %arg3[%c6, %c0_75] : memref<16x128xf32, #tpu.memory_space<vmem>>, vector<1x16xf32>
    %155 = arith.addf %153, %154 : vector<1x16xf32>
    %cst_76 = arith.constant 0.000000e+00 : f32
    %156 = vector.broadcast %cst_76 : f32 to vector<1x16xf32>
    %157 = arith.cmpf ogt, %155, %156 : vector<1x16xf32>
    %cst_77 = arith.constant 0.00999999977 : f32
    %158 = vector.broadcast %cst_77 : f32 to vector<1x16xf32>
    %159 = arith.mulf %158, %155 : vector<1x16xf32>
    %160 = arith.select %157, %155, %159 : vector<1x16xi1>, vector<1x16xf32>
    %c7 = arith.constant 7 : index
    %c0_78 = arith.constant 0 : index
    %161 = vector.load %arg3[%c7, %c0_78] : memref<16x128xf32, #tpu.memory_space<vmem>>, vector<1x16xf32>
    %162 = arith.mulf %160, %161 : vector<1x16xf32>
    %cst_79 = arith.constant dense<0.000000e+00> : vector<1xf32>
    %163 = vector.multi_reduction <add>, %162, %cst_79 [1] : vector<1x16xf32> to vector<1xf32>
    %164 = vector.shape_cast %163 : vector<1xf32> to vector<1x1xf32>
    %c8_80 = arith.constant 8 : index
    %c0_81 = arith.constant 0 : index
    %165 = vector.load %arg3[%c8_80, %c0_81] : memref<16x128xf32, #tpu.memory_space<vmem>>, vector<1x1xf32>
    %166 = arith.addf %164, %165 : vector<1x1xf32>
    %cst_82 = arith.constant 0.000000e+00 : f32
    %167 = vector.broadcast %cst_82 : f32 to vector<1x1xf32>
    %168 = arith.cmpf ogt, %166, %167 : vector<1x1xf32>
    %cst_83 = arith.constant 0.00999999977 : f32
    %169 = vector.broadcast %cst_83 : f32 to vector<1x1xf32>
    %170 = arith.mulf %169, %166 : vector<1x1xf32>
    %171 = arith.select %168, %166, %170 : vector<1x1xi1>, vector<1x1xf32>
    %172 = vector.shape_cast %171 : vector<1x1xf32> to vector<1x1x1xf32>
    %173 = vector.shape_cast %172 : vector<1x1x1xf32> to vector<1x1x1xf32>
    %174 = vector.broadcast %173 : vector<1x1x1xf32> to vector<1x8x128xf32>
    %c0_84 = arith.constant 0 : index
    %c0_85 = arith.constant 0 : index
    %c0_86 = arith.constant 0 : index
    %175 = vector.load %arg4[%c0_84, %c0_85, %c0_86] : memref<1x8x128xf32, #tpu.memory_space<vmem>>, vector<1x8x128xf32>
    tpu.vector_store %arg4[%c0_84, %c0_85, %c0_86], %174 {strides = array<i32>} : memref<1x8x128xf32, #tpu.memory_space<vmem>>, vector<1x8x128xf32>,
    return
  }
  func.func @transform_0(%arg0: i32) -> (i32, i32, i32) {
    %c0_i32 = arith.constant 0 : i32
    %c0_i32_0 = arith.constant 0 : i32
    %c0_i32_1 = arith.constant 0 : i32
    return %arg0, %c0_i32, %c0_i32_0 : i32, i32, i32
  }
  func.func @transform_1(%arg0: i32) -> (i32, i32) {
    %c0_i32 = arith.constant 0 : i32
    %c0_i32_0 = arith.constant 0 : i32
    %c0_i32_1 = arith.constant 0 : i32
    return %c0_i32, %c0_i32_0 : i32, i32
  }
  func.func @transform_2(%arg0: i32) -> (i32, i32) {
    %c0_i32 = arith.constant 0 : i32
    %c0_i32_0 = arith.constant 0 : i32
    %c0_i32_1 = arith.constant 0 : i32
    return %c0_i32, %c0_i32_0 : i32, i32
  }
  func.func @transform_3(%arg0: i32) -> (i32, i32, i32) {
    %c0_i32 = arith.constant 0 : i32
    %c0_i32_0 = arith.constant 0 : i32
    %c0_i32_1 = arith.constant 0 : i32
    return %arg0, %c0_i32, %c0_i32_0 : i32, i32, i32
  }
}

</mosaic_0001>

<bundles_post_ra>
// kernel: time_slice_pre_forward.1
= control target key start
LH: loop header
LB: loop body
LE: loop exit
PB: predicated region body
PF: predicated region fallthrough
CT: control target
= control target key end

     0   :  { %8 = vsyncpa [#allocation3], 0  ;;  %s2308_s12 = smov 0   ;;  %s2576_s0 = inlined_call_operand.vmem [shape: f32[2,32,4], index: 0, kind: input, shape index: {}]   ;;  %s2577_s1 = inlined_call_operand.hbm [shape: f32[136,128], index: 1, kind: input, shape index: {}]   ;;  %s2578_s2 = inlined_call_operand.vmem [shape: f32[16,128], index: 2, kind: input, shape index: {}]   ;;  %s2579_s3 = inlined_call_operand.vmem [shape: f32[2,8,128], index: 3, kind: output, shape index: {}]  }
   0x1 LB: > { %s1944_s13 = sadd.s32 4294967295, %s2281_s12   ;;  %p1946_p0 = scmp.ge.s32.totalorder %s2281_s12, 1  ;;  %s2281_s12 = sphi %s2308_s12, %s14_s12  }
   0x2   : > { %p113_p1 = scmp.lt.s32.totalorder %s2281_s12, 3  ;;  %s2283_s14 = smov [#allocation2]  }
   0x3   : > { %s125_s15 = sshll.u32 %s2283_s14, 4  ;;  %p2230_p3 = scmp.eq.s32.totalorder %s1944_s13, 0  ;;  %s126_s15 = int_to_ptr.vmem [resolvable:$true] %s125_s15 }
   0x4   : > { %p2316_p2 = pnand %p1946_p0, %p113_p1  ;;  %s2256_s17 = scalar_lea.vmem %s126_s15, 2176 }
   0x5   : > { %p2257_p7 = scmp.ne.s32.totalorder %s126_s15, %s2256_s17  ;;  %p2264_p10 = scmp.lt.s32.totalorder %s126_s15, %s126_s15 }
   0x6   : > { %p2226_p4 = pneg %p2316_p2  ;;  %p2265_p11 = scmp.lt.s32.totalorder %s2256_s17, %s2256_s17 }
   0x8   : > { %p2227_p5 = pnand %p2230_p3, %p2226_p4  ;;  %p2266_p12 = por %p2265_p11, %p2264_p10 }
   0xa   : > { %p2247_p6 = pneg %p2227_p5 }
   0xc   : > { %p2259_p8 = pnand %p2257_p7, %p2247_p6 }
   0xe   : > { %p2260_p9 = pneg %p2259_p8 }
  0x10   : > { %p2267_p13 = pnand %p2266_p12, %p2260_p9 }
  0x12   : > { %2270 = shalt.err (!%p2267_p13)
}
  0x13   : > { %s2284_s18 = smov 128   ;;  %s2285_s19 = smov 8  }
  0x14   : > { %2229 = dma.hbm_to_vmem [thread:$0]  (!%p2227_p5), %s2577_s1, 2176, %s126_s15, [#allocation3], %s2284_s18, %s2284_s18, %s2285_s19  }
  0x15   : > { %152 = sbr.rel (%p2316_p2) target bundleno = 1508 (0x5e4), region = 32 }
  0x1a   : > { %2276 = dma.done.wait (%p2230_p3), [#allocation3], 2176  }
  0x1b   : > { %2278 = vsyncadd (%p2230_p3), [#allocation3], 4294965120  ;;  %p175_p0 = scmp.lt.s32.totalorder %s1944_s13, 1  ;;  %vm256_vm0 = vcmask 1043456   ;;  %vm243_vm1 = vcmask 31744   ;;  %v590_v7 = vld [vmem:[#allocation2 + $0xc] sm:$0xff]  ;;  %v184_v11 = vlaneseq }
  0x1c   : > { %v242_v0 = vld [vmem:[#allocation2] sm:$0xf]  ;;  %v458_v3 = vld [vmem:[#allocation2 + $0x4] sm:$0xf]  ;;  %v241_v4 = vld [vmem:[#allocation2 + $0x8] sm:$0xf] }
  0x1d   : > { %s2582_s13 = smov (!%p175_p0, %s1944_s13), 1  ;;  %2095 = vmatprep.subr.msk.mxu0 %vm256_vm0, %v242_v0  ;;  %2103 = vmatprep.subr.msk.mxu1 %vm256_vm0, %v241_v4  ;;  %v589_v8 = vld [vmem:[#allocation2 + $0x1c] sm:$0xff]  ;;  %v2374_v9 = vld [vmem:[#allocation2 + $0x14] sm:$0xff]  ;;  %v2377_v10 = vld [vmem:[#allocation2 + $0x24] sm:$0xf]  ;;  %v2381_v12 = vshrl.u32 %v184_v11, 7 }
  0x1e   : > { %s2020_s22 = sshll.u32 %s2582_s13, 5  ;;  %2096 = vmatpush3.msk.msra.mxu0 %vm256_vm0, %v242_v0  ;;  %2104 = vmatpush3.msk.msra.mxu1 %vm256_vm0, %v241_v4  ;;  %v1969_v45 = vld [vmem:[%s2578_s2] ss:$0 sm:$0xff]  ;;  %vm591_vm8 = vcmask 64512   ;;  %v1003_v4 = vld [vmem:[#allocation2 + $0x38] sm:$0xff]  ;;  %vm2287_vm12 = vmmov 0  }
  0x1f   : > { %s179_s25 = scalar_lea.vmem %s2576_s0, %s2020_s22  ;;  %2111 = vmatprep.subr.msk.mxu0 %vm256_vm0, %v458_v3  ;;  %2119 = vmatprep.subr.mxu1 %v590_v7  ;;  %v187_v16 = vadd.s32 16, %v2381_v12  ;;  %v2385_v20 = vand.u32 15, %v2381_v12  ;;  %vm349_vm2 = vcmp.lt.s32.totalorder %v2381_v12, 2  ;;  %vm551_vm4 = vcmp.lt.s32.totalorder %v2381_v12, 1  ;;  %s1953_s19 = sshll.u32 %s2582_s13, 3 }
  0x20   : > { %v2336_v1 = vld [vmem:[%s179_s25] sm:$0xff]  ;;  %v2338_v2 = vld [vmem:[%s179_s25 + $0x8] sm:$0xff]  ;;  %v2343_v5 = vld [vmem:[%s179_s25 + $0x10] sm:$0xff]  ;;  %vm1106_vm9 = vcmp.lt.s32.totalorder %v2381_v12, 4  ;;  %vm1786_vm14 = vcmask 261120   ;;  %s183_s22 = scalar_lea.vmem %s2579_s3, %s1953_s19 }
  0x21   : > { %2097 = vmatprep.mubr.msk.f32.mxu0 %vm243_vm1, %v2336_v1  ;;  %v2353_v6 = vld [vmem:[%s179_s25 + $0x18] sm:$0xff]  ;;  %2105 = vmatprep.mubr.msk.f32.mxu1 %vm243_vm1, %v2336_v1  ;;  %v2388_v25 = vand.u32 15, %v187_v16  ;;  %vm354_vm3 = vcmp.lt.s32.totalorder %v2385_v20, 2  ;;  %vm556_vm6 = vcmp.lt.s32.totalorder %v2385_v20, 1  ;;  %vm1111_vm10 = vcmp.lt.s32.totalorder %v2385_v20, 4  ;;  %v1784_v12 = vld [vmem:[#allocation2 + $0x80] sm:$0xff] }
  0x22   : > { %2098 = vmatmul.mubr.msk.f32.vlgmr.msra.gmra.mxu0 %vm243_vm1, %v2338_v2  ;;  %2106 = vmatmul.mubr.msk.f32.vlgmr.msra.gmra.mxu1 %vm243_vm1, %v2338_v2 }
  0x23   : > { %2112 = vmatpush3.msk.msra.mxu0 %vm256_vm0, %v458_v3  ;;  %2100 = vmatprep.mubr.msk.f32.mxu0 %vm243_vm1, %v2343_v5  ;;  %vm356_vm5 = vcmp.lt.s32.totalorder %v2388_v25, 2  ;;  %vm558_vm7 = vcmp.lt.s32.totalorder %v2388_v25, 1  ;;  %v1004_v3 = vld [vmem:[#allocation2 + $0x28] sm:$0xff]  ;;  %vm1113_vm11 = vcmp.lt.s32.totalorder %v2388_v25, 4 }
  0x24   : > { %2108 = vmatprep.mubr.msk.f32.mxu1 %vm243_vm1, %v2343_v5  ;;  %2127 = vmatprep.subr.mxu0 %v589_v8 }
  0x25   : > { %2120 = vmatpush3.msra.mxu1 %v590_v7 }
  0x26   : > { %2101 = vmatmul.mubr.msk.f32.gmra.mxu0 %vm243_vm1, %v2353_v6  ;;  %2109 = vmatmul.mubr.msk.f32.gmra.mxu1 %vm243_vm1, %v2353_v6 }
  0x27   : > { %2113 = vmatprep.mubr.msk.f32.mxu0 %vm243_vm1, %v2336_v1  ;;  %2135 = vmatprep.subr.mxu1 %v2374_v9 }
  0x2a   : > { %2114 = vmatmul.mubr.msk.f32.vlgmr.msra.gmra.mxu0 %vm243_vm1, %v2338_v2 }
  0x2b   : > { %2116 = vmatprep.mubr.msk.f32.mxu0 %vm243_vm1, %v2343_v5  ;;  %2128 = vmatpush3.msra.mxu0 %v589_v8 }
  0x2c   : > { %2143 = vmatprep.subr.msk.mxu0 %vm256_vm0, %v2377_v10 }
  0x2e   : > { %2117 = vmatmul.mubr.msk.f32.gmra.mxu0 %vm243_vm1, %v2353_v6 }
  0xe2   : > { %v2099_v13 = vpop.f32.mrf.mxu0  ;;  %v2107_v15 = vpop.f32.mrf.mxu1 }
  0xe3   : > { %v346_v23 = vrot.slane %v2099_v13, 6 }
  0xe4   : > { %v326_v14 = vpop.f32.mrf.mxu0  ;;  %v439_v22 = vpop.f32.mrf.mxu1 }
  0xe5   : > { %v345_v18 = vrot.slane %v326_v14, 6 }
  0xe6   : > { %v2102_v17 = vpop.f32.mrf.mxu0  ;;  %v2110_v29 = vpop.f32.mrf.mxu1 }
  0xe7   : > { %v348_v19 = vrot.slane %v2102_v17, 6  ;;  %v352_v27 = vsel %vm349_vm2, %v345_v18, %v346_v23 }
  0xe8   : > { %v336_v21 = vpop.f32.mrf.mxu0  ;;  %v445_v34 = vadd.f32 %v2107_v15, %v352_v27  ;;  %v449_v41 = vpop.f32.mrf.mxu1 }
  0xe9   : > { %v347_v24 = vrot.slane %v336_v21, 6  ;;  %v353_v28 = vsel %vm349_vm2, %v348_v19, %v345_v18 }
  0xea   : > { %v2115_v26 = vpop.f32.mrf.mxu0  ;;  %v366_v35 = vsel %vm354_vm3, 0.0, %v353_v28 }
  0xeb   : > { %v548_v31 = vrot.slane %v2115_v26, 7  ;;  %v351_v32 = vsel %vm349_vm2, %v346_v23, %v347_v24  ;;  %v350_v37 = vsel %vm349_vm2, %v347_v24, %v348_v19  ;;  %v440_v44 = vadd.f32 %v439_v22, %v366_v35 }
  0xec   : > { %v528_v30 = vpop.f32.mrf.mxu0  ;;  %v368_v40 = vsel %vm356_vm5, 0.0, %v351_v32  ;;  %v455_v48 = vadd.f32 %v2110_v29, %v350_v37 }
  0xed   : > { %v547_v33 = vrot.slane %v528_v30, 7  ;;  %v450_v50 = vadd.f32 %v449_v41, %v368_v40 }
  0xee   : > { %v2118_v36 = vpop.f32.mrf.mxu0 }
  0xef   : > { %v554_v38 = vsel %vm551_vm4, %v547_v33, %v548_v31  ;;  %v550_v39 = vrot.slane %v2118_v36, 7 }
  0xf0   : > { %v573_v42 = vadd.f32 %v554_v38, %v445_v34  ;;  %v538_v43 = vpop.f32.mrf.mxu0  ;;  %v1982_v34 = vld [vmem:[%s2578_s2 + $0x1] ss:$0 sm:$0xff] }
  0xf1   : > { %v555_v46 = vsel %vm551_vm4, %v550_v39, %v547_v33  ;;  %v549_v47 = vrot.slane %v538_v43, 7 }
  0xf2   : > { %v568_v49 = vsel %vm556_vm6, 0.0, %v555_v46  ;;  %v582_v54 = vadd.f32 %v1969_v45, %v573_v42  ;;  %v1983_v42 = vld [vmem:[%s2578_s2 + $0x2] ss:$0 sm:$0xff] }
  0xf3   : > { %v572_v51 = vadd.f32 %v568_v49, %v440_v44  ;;  %v552_v52 = vsel %vm551_vm4, %v549_v47, %v550_v39  ;;  %v553_v53 = vsel %vm551_vm4, %v548_v31, %v549_v47 }
  0xf4   : > { %v570_v55 = vsel %vm558_vm7, 0.0, %v553_v53  ;;  %v575_v56 = vadd.f32 %v552_v52, %v455_v48  ;;  %v586_v61 = vmax.f32 %v582_v54, 0.0 }
  0xf5   : > { %v574_v57 = vadd.f32 %v570_v55, %v450_v50  ;;  %v581_v58 = vadd.f32 %v1969_v45, %v572_v51 }
  0xf6   : > { %v584_v62 = vadd.f32 %v1969_v45, %v575_v56 }
  0xf7   : > { %v585_v59 = vmax.f32 %v581_v58, 0.0  ;;  %v583_v60 = vadd.f32 %v1969_v45, %v574_v57 }
  0xf8   : > { %v588_v0 = vmax.f32 %v584_v62, 0.0 }
  0xf9   : > { %2121 = vmatprep.mubr.msk.f32.mxu1 %vm591_vm8, %v585_v59  ;;  %2129 = vmatprep.mubr.msk.f32.mxu0 %vm591_vm8, %v585_v59  ;;  %v587_v63 = vmax.f32 %v583_v60, 0.0 }
  0xfa   : > { %2122 = vmatmul.mubr.msk.f32.vlgmr.msra.gmra.mxu1 %vm591_vm8, %v586_v61  ;;  %2130 = vmatmul.mubr.msk.f32.vlgmr.msra.gmra.mxu0 %vm591_vm8, %v586_v61 }
  0xfb   : > { %2124 = vmatprep.mubr.msk.f32.mxu1 %vm591_vm8, %v587_v63  ;;  %2132 = vmatprep.mubr.msk.f32.mxu0 %vm591_vm8, %v587_v63 }
  0xfc   : > { %2136 = vmatpush3.msra.mxu1 %v2374_v9  ;;  %2144 = vmatpush3.msk.msra.mxu0 %vm256_vm0, %v2377_v10  ;;  %vm1865_vm0 = vcmask 122880  }
  0xfd   : > { %2151 = vmatprep.subr.mxu1 %v1004_v3  ;;  %2159 = vmatprep.subr.mxu0 %v1003_v4 }
  0xfe   : > { %2125 = vmatmul.mubr.msk.f32.gmra.mxu1 %vm591_vm8, %v588_v0  ;;  %2133 = vmatmul.mubr.msk.f32.gmra.mxu0 %vm591_vm8, %v588_v0 }
  0xff   : > { %2137 = vmatprep.mubr.msk.f32.mxu1 %vm591_vm8, %v585_v59  ;;  %2145 = vmatprep.mubr.msk.f32.mxu0 %vm243_vm1, %v2336_v1  ;;  %v2445_v1 = vld [vmem:[#allocation2 + $0x30] sm:$0xff] }
 0x102   : > { %2138 = vmatmul.mubr.msk.f32.vlgmr.msra.gmra.mxu1 %vm591_vm8, %v586_v61  ;;  %2146 = vmatmul.mubr.msk.f32.vlgmr.msra.gmra.mxu0 %vm243_vm1, %v2338_v2 }
 0x103   : > { %2140 = vmatprep.mubr.msk.f32.mxu1 %vm591_vm8, %v587_v63  ;;  %2148 = vmatprep.mubr.msk.f32.mxu0 %vm243_vm1, %v2343_v5 }
 0x104   : > { %2152 = vmatpush3.msra.mxu1 %v1004_v3  ;;  %2160 = vmatpush3.msra.mxu0 %v1003_v4 }
 0x105   : > { %2167 = vmatprep.subr.mxu1 %v2445_v1 }
 0x106   : > { %2141 = vmatmul.mubr.msk.f32.gmra.mxu1 %vm591_vm8, %v588_v0  ;;  %2149 = vmatmul.mubr.msk.f32.gmra.mxu0 %vm243_vm1, %v2353_v6 }
 0x1ba   : > { %v2123_v2 = vpop.f32.mrf.mxu1  ;;  %v2131_v7 = vpop.f32.mrf.mxu0 }
 0x1bb   : > { %v690_v15 = vrot.slane %v2123_v2, 6 }
 0x1bc   : > { %v670_v8 = vpop.f32.mrf.mxu1  ;;  %v767_v9 = vpop.f32.mrf.mxu0 }
 0x1bd   : > { %v689_v11 = vrot.slane %v670_v8, 6 }
 0x1be   : > { %v2126_v5 = vpop.f32.mrf.mxu1  ;;  %v2134_v10 = vpop.f32.mrf.mxu0 }
 0x1bf   : > { %v692_v13 = vrot.slane %v2126_v5, 6  ;;  %v695_v19 = vsel %vm349_vm2, %v689_v11, %v690_v15 }
 0x1c0   : > { %v680_v14 = vpop.f32.mrf.mxu1  ;;  %v777_v6 = vpop.f32.mrf.mxu0  ;;  %v773_v28 = vadd.f32 %v2131_v7, %v695_v19 }
 0x1c1   : > { %v691_v16 = vrot.slane %v680_v14, 6  ;;  %v696_v21 = vsel %vm349_vm2, %v692_v13, %v689_v11  ;;  %v1328_v11 = vld [vmem:[#allocation2 + $0x40] sm:$0xff] }
 0x1c2   : > { %v2139_v17 = vpop.f32.mrf.mxu1  ;;  %v2147_v18 = vpop.f32.mrf.mxu0  ;;  %v697_v29 = vsel %vm354_vm3, 0.0, %v696_v21  ;;  %2175 = vmatprep.subr.mxu0 %v1328_v11 }
 0x1c3   : > { %v694_v24 = vsel %vm349_vm2, %v690_v15, %v691_v16  ;;  %v873_v26 = vrot.slane %v2139_v17, 7  ;;  %v693_v31 = vsel %vm349_vm2, %v691_v16, %v692_v13  ;;  %v768_v39 = vadd.f32 %v767_v9, %v697_v29  ;;  %v1327_v13 = vld [vmem:[#allocation2 + $0x50] sm:$0xff] }
 0x1c4   : > { %v853_v22 = vpop.f32.mrf.mxu1  ;;  %v976_v23 = vpop.f32.mrf.mxu0  ;;  %v699_v35 = vsel %vm356_vm5, 0.0, %v694_v24  ;;  %v783_v43 = vadd.f32 %v2134_v10, %v693_v31  ;;  %v982_v53 = vadd.f32 %v2147_v18, %v1983_v42 }
 0x1c5   : > { %v872_v27 = vrot.slane %v853_v22, 7  ;;  %v778_v46 = vadd.f32 %v777_v6, %v699_v35  ;;  %v977_v59 = vadd.f32 %v1983_v42, %v976_v23 }
 0x1c6   : > { %v2142_v30 = vpop.f32.mrf.mxu1  ;;  %v2150_v38 = vpop.f32.mrf.mxu0 }
 0x1c7   : > { %v878_v32 = vsel %vm551_vm4, %v872_v27, %v873_v26  ;;  %v875_v33 = vrot.slane %v2142_v30, 7  ;;  %v992_v0 = vadd.f32 %v2150_v38, %v1983_v42 }
 0x1c8   : > { %v885_v36 = vadd.f32 %v878_v32, %v773_v28  ;;  %v863_v37 = vpop.f32.mrf.mxu1  ;;  %v986_v54 = vpop.f32.mrf.mxu0 }
 0x1c9   : > { %v879_v40 = vsel %vm551_vm4, %v875_v33, %v872_v27  ;;  %v874_v41 = vrot.slane %v863_v37, 7  ;;  %v987_v61 = vadd.f32 %v1983_v42, %v986_v54 }
 0x1ca   : > { %v880_v44 = vsel %vm556_vm6, 0.0, %v879_v40  ;;  %v894_v45 = vadd.f32 %v1982_v34, %v885_v36 }
 0x1cb   : > { %v876_v47 = vsel %vm551_vm4, %v874_v41, %v875_v33  ;;  %v877_v48 = vsel %vm551_vm4, %v873_v26, %v874_v41  ;;  %v884_v49 = vadd.f32 %v880_v44, %v768_v39 }
 0x1cc   : > { %v882_v50 = vsel %vm558_vm7, 0.0, %v877_v48  ;;  %v887_v51 = vadd.f32 %v876_v47, %v783_v43  ;;  %v898_v52 = vmax.f32 %v894_v45, 0.0  ;;  %v2001_v43 = vld [vmem:[%s2578_s2 + $0x3] ss:$0 sm:$0xff] }
 0x1cd   : > { %v893_v55 = vadd.f32 %v1982_v34, %v884_v49  ;;  %v886_v56 = vadd.f32 %v882_v50, %v778_v46 }
 0x1ce   : > { %v896_v57 = vadd.f32 %v1982_v34, %v887_v51  ;;  %v996_v62 = vadd.f32 %v982_v53, %v898_v52 }
 0x1cf   : > { %v897_v58 = vmax.f32 %v893_v55, 0.0  ;;  %v895_v60 = vadd.f32 %v1982_v34, %v886_v56 }
 0x1d0   : > { %v900_v63 = vmax.f32 %v896_v57, 0.0  ;;  %v2478_v8 = vmax.f32 %v996_v62, 0.0  ;;  %v2286_v62 = vmov 0.0  }
 0x1d1   : > { %v995_v3 = vadd.f32 %v977_v59, %v897_v58  ;;  %v899_v4 = vmax.f32 %v895_v60, 0.0 }
 0x1d2   : > { %v998_v9 = vadd.f32 %v992_v0, %v900_v63  ;;  %v1627_v63 = vld [vmem:[#allocation2 + $0x60] sm:$0xff] }
 0x1d3   : > { %v999_v2 = vmax.f32 %v995_v3, 0.0  ;;  %v997_v7 = vadd.f32 %v987_v61, %v899_v4 }
 0x1d4   : > { %v2488_v10 = vmax.f32 %v998_v9, 0.0 }
 0x1d5   : > { %v1001_v5 = vmax.f32 %v997_v7, 0.0  ;;  %2153 = vmatprep.mubr.msk.f32.mxu1 %vm591_vm8, %v999_v2  ;;  %2161 = vmatprep.mubr.msk.f32.mxu0 %vm591_vm8, %v999_v2 }
 0x1d6   : > { %2154 = vmatmul.mubr.msk.f32.vlgmr.msra.gmra.mxu1 %vm591_vm8, %v2478_v8  ;;  %2162 = vmatmul.mubr.msk.f32.vlgmr.msra.gmra.mxu0 %vm591_vm8, %v2478_v8 }
 0x1d7   : > { %2156 = vmatprep.mubr.msk.f32.mxu1 %vm591_vm8, %v1001_v5  ;;  %2164 = vmatprep.mubr.msk.f32.mxu0 %vm591_vm8, %v1001_v5 }
 0x1d8   : > { %2168 = vmatpush3.msra.mxu1 %v2445_v1  ;;  %2176 = vmatpush3.msra.mxu0 %v1328_v11  ;;  %v1517_v1 = vld [vmem:[#allocation2 + $0x48] sm:$0xff] }
 0x1d9   : > { %2183 = vmatprep.subr.mxu1 %v1327_v13  ;;  %2191 = vmatprep.subr.mxu0 %v1517_v1 }
 0x1da   : > { %2157 = vmatmul.mubr.msk.f32.gmra.mxu1 %vm591_vm8, %v2488_v10  ;;  %2165 = vmatmul.mubr.msk.f32.gmra.mxu0 %vm591_vm8, %v2488_v10 }
 0x1db   : > { %2169 = vmatprep.mubr.msk.f32.mxu1 %vm591_vm8, %v999_v2 }
 0x1de   : > { %2170 = vmatmul.mubr.msk.f32.vlgmr.msra.gmra.mxu1 %vm591_vm8, %v2478_v8 }
 0x1df   : > { %2172 = vmatprep.mubr.msk.f32.mxu1 %vm591_vm8, %v1001_v5  ;;  %2184 = vmatpush3.msra.mxu1 %v1327_v13 }
 0x1e0   : > { %2199 = vmatprep.subr.mxu1 %v2286_v62 }
 0x1e2   : > { %2173 = vmatmul.mubr.msk.f32.gmra.mxu1 %vm591_vm8, %v2488_v10 }
 0x296   : > { %v2155_v14 = vpop.f32.mrf.mxu1  ;;  %v2163_v15 = vpop.f32.mrf.mxu0 }
 0x297   : > { %v1103_v21 = vrot.slane %v2155_v14, 4 }
 0x298   : > { %v1083_v6 = vpop.f32.mrf.mxu1  ;;  %v1193_v23 = vpop.f32.mrf.mxu0 }
 0x299   : > { %v1102_v17 = vrot.slane %v1083_v6, 4 }
 0x29a   : > { %v2158_v16 = vpop.f32.mrf.mxu1  ;;  %v2166_v34 = vpop.f32.mrf.mxu0 }
 0x29b   : > { %v1105_v18 = vrot.slane %v2158_v16, 4  ;;  %v1109_v26 = vsel %vm1106_vm9, %v1102_v17, %v1103_v21 }
 0x29c   : > { %v1093_v19 = vpop.f32.mrf.mxu1  ;;  %v1199_v32 = vadd.f32 %v2163_v15, %v1109_v26  ;;  %v1203_v47 = vpop.f32.mrf.mxu0  ;;  %v2014_v26 = vld [vmem:[%s2578_s2 + $0x4] ss:$0 sm:$0xff] }
 0x29d   : > { %v1104_v22 = vrot.slane %v1093_v19, 4  ;;  %v1110_v27 = vsel %vm1106_vm9, %v1105_v18, %v1102_v17 }
 0x29e   : > { %v2171_v24 = vpop.f32.mrf.mxu1  ;;  %v1123_v33 = vsel %vm1111_vm10, 0.0, %v1110_v27 }
 0x29f   : > { %v1108_v29 = vsel %vm1106_vm9, %v1103_v21, %v1104_v22  ;;  %v1299_v30 = vrot.slane %v2171_v24, 6  ;;  %v1107_v36 = vsel %vm1106_vm9, %v1104_v22, %v1105_v18  ;;  %v1194_v42 = vadd.f32 %v1193_v23, %v1123_v33 }
 0x2a0   : > { %v1279_v28 = vpop.f32.mrf.mxu1  ;;  %v1125_v39 = vsel %vm1113_vm11, 0.0, %v1108_v29  ;;  %v1209_v46 = vadd.f32 %v2166_v34, %v1107_v36 }
 0x2a1   : > { %v1298_v31 = vrot.slane %v1279_v28, 6  ;;  %v1204_v49 = vadd.f32 %v1203_v47, %v1125_v39 }
 0x2a2   : > { %v2174_v35 = vpop.f32.mrf.mxu1 }
 0x2a3   : > { %v1304_v37 = vsel %vm349_vm2, %v1298_v31, %v1299_v30  ;;  %v1301_v38 = vrot.slane %v2174_v35, 6 }
 0x2a4   : > { %v1311_v40 = vadd.f32 %v1304_v37, %v1199_v32  ;;  %v1289_v41 = vpop.f32.mrf.mxu1 }
 0x2a5   : > { %v1305_v44 = vsel %vm349_vm2, %v1301_v38, %v1298_v31  ;;  %v1300_v45 = vrot.slane %v1289_v41, 6 }
 0x2a6   : > { %v1306_v48 = vsel %vm354_vm3, 0.0, %v1305_v44  ;;  %v1320_v53 = vadd.f32 %v2001_v43, %v1311_v40 }
 0x2a7   : > { %v1310_v50 = vadd.f32 %v1306_v48, %v1194_v42  ;;  %v1302_v51 = vsel %vm349_vm2, %v1300_v45, %v1301_v38  ;;  %v1303_v52 = vsel %vm349_vm2, %v1299_v30, %v1300_v45  ;;  %v1783_v45 = vld [vmem:[#allocation2 + $0x78] sm:$0xff] }
 0x2a8   : > { %v1308_v54 = vsel %vm356_vm5, 0.0, %v1303_v52  ;;  %v1313_v55 = vadd.f32 %v1302_v51, %v1209_v46  ;;  %v1324_v60 = vmax.f32 %v1320_v53, 0.0 }
 0x2a9   : > { %v1312_v56 = vadd.f32 %v1308_v54, %v1204_v49  ;;  %v1319_v57 = vadd.f32 %v2001_v43, %v1310_v50  ;;  %v1776_v49 = vld [vmem:[%s2578_s2 + $0x5] sm:$0x1] }
 0x2aa   : > { %v1322_v20 = vadd.f32 %v2001_v43, %v1313_v55  ;;  %v1785_v55 = vld [vmem:[%s2578_s2 + $0x6] sm:$0x1] }
 0x2ab   : > { %v1323_v58 = vmax.f32 %v1319_v57, 0.0  ;;  %v1321_v59 = vadd.f32 %v2001_v43, %v1312_v56  ;;  %v1626_v43 = vld [vmem:[#allocation2 + $0x58] sm:$0xff] }
 0x2ac   : > { %v1326_v25 = vmax.f32 %v1322_v20, 0.0 }
 0x2ad   : > { %2177 = vmatprep.mubr.msk.f32.mxu0 %vm591_vm8, %v1323_v58  ;;  %2185 = vmatprep.mubr.msk.f32.mxu1 %vm591_vm8, %v1323_v58  ;;  %v1325_v61 = vmax.f32 %v1321_v59, 0.0 }
 0x2ae   : > { %2178 = vmatmul.mubr.msk.f32.vlgmr.msra.gmra.mxu0 %vm591_vm8, %v1324_v60  ;;  %2186 = vmatmul.mubr.msk.f32.vlgmr.msra.gmra.mxu1 %vm591_vm8, %v1324_v60 }
 0x2af   : > { %2180 = vmatprep.mubr.msk.f32.mxu0 %vm591_vm8, %v1325_v61  ;;  %2188 = vmatprep.mubr.msk.f32.mxu1 %vm591_vm8, %v1325_v61 }
 0x2b0   : > { %2192 = vmatpush3.msra.mxu0 %v1517_v1  ;;  %2200 = vmatpush3.msra.mxu1 %v1627_v63 }
 0x2b1   : > { %2209 = vmatprep.subr.mxu0 %v2286_v62  ;;  %2204 = vmatprep.subr.mxu1 %v2286_v62 }
 0x2b2   : > { %2181 = vmatmul.mubr.msk.f32.gmra.mxu0 %vm591_vm8, %v1326_v25  ;;  %2189 = vmatmul.mubr.msk.f32.gmra.mxu1 %vm591_vm8, %v1326_v25 }
 0x2b3   : > { %2193 = vmatprep.mubr.msk.f32.mxu0 %vm591_vm8, %v1323_v58  ;;  %2201 = vmatprep.mubr.msk.f32.mxu1 %vm2287_vm12, %v2286_v62 }
 0x2b6   : > { %2194 = vmatmul.mubr.msk.f32.vlgmr.msra.gmra.mxu0 %vm591_vm8, %v1324_v60  ;;  %v1863_v60 = vld [vmem:[%s2578_s2 + $0x7] sm:$0x1] }
 0x2b7   : > { %2196 = vmatprep.mubr.msk.f32.mxu0 %vm591_vm8, %v1325_v61  ;;  %2210 = vmatpush3.msra.mxu0 %v1784_v12 }
 0x2b8   : > { %2211 = vmatprep.subr.mxu0 %v2286_v62 }
 0x2b9   : > { %2212 = vmatpush3.msra.mxu0 %v1783_v45 }
 0x2ba   : > { %2197 = vmatmul.mubr.msk.f32.gmra.mxu0 %vm591_vm8, %v1326_v25  ;;  %2213 = vmatprep.subr.mxu0 %v2286_v62 }
 0x2bb   : > { %2217 = vmatprep.mubr.msk.f32.mxu0 %vm2287_vm12, %v2286_v62 }
 0x36e   : > { %v2179_v0 = vpop.f32.mrf.mxu0  ;;  %v2187_v3 = vpop.f32.mrf.mxu1 }
 0x36f   : > { %v1427_v1 = vrot.slane %v2179_v0, 4 }
 0x370   : > { %v1407_v4 = vpop.f32.mrf.mxu0  ;;  %v1500_v2 = vpop.f32.mrf.mxu1 }
 0x371   : > { %v1426_v5 = vrot.slane %v1407_v4, 4 }
 0x372   : > { %v2182_v7 = vpop.f32.mrf.mxu0  ;;  %v2190_v9 = vpop.f32.mrf.mxu1 }
 0x373   : > { %v1431_v6 = vsel %vm1106_vm9, %v1426_v5, %v1427_v1  ;;  %v1429_v17 = vrot.slane %v2182_v7, 4 }
 0x374   : > { %v1417_v11 = vpop.f32.mrf.mxu0  ;;  %v1509_v13 = vpop.f32.mrf.mxu1  ;;  %v1505_v21 = vadd.f32 %v2187_v3, %v1431_v6 }
 0x375   : > { %v1428_v15 = vrot.slane %v1417_v11, 4 }
 0x376   : > { %v2195_v14 = vpop.f32.mrf.mxu0 }
 0x377   : > { %v1604_v18 = vrot.slane %v2195_v14, 6  ;;  %v1430_v23 = vsel %vm1106_vm9, %v1428_v15, %v1429_v17 }
 0x378   : > { %v1584_v16 = vpop.f32.mrf.mxu0  ;;  %v1514_v31 = vadd.f32 %v2190_v9, %v1430_v23 }
 0x379   : > { %v1603_v19 = vrot.slane %v1584_v16, 6 }
 0x37a   : > { %v2198_v22 = vpop.f32.mrf.mxu0 }
 0x37b   : > { %v1608_v24 = vsel %vm349_vm2, %v1603_v19, %v1604_v18  ;;  %v1606_v29 = vrot.slane %v2198_v22, 6 }
 0x37c   : > { %v1611_v27 = vadd.f32 %v1608_v24, %v1505_v21  ;;  %v1594_v28 = vpop.f32.mrf.mxu0 }
 0x37d   : > { %v1605_v30 = vrot.slane %v1594_v28, 6 }
 0x37e   : > { %v1618_v32 = vadd.f32 %v2014_v26, %v1611_v27 }
 0x37f   : > { %v1607_v33 = vsel %vm349_vm2, %v1605_v30, %v1606_v29 }
 0x380   : > { %v1612_v34 = vadd.f32 %v1607_v33, %v1514_v31  ;;  %v1620_v35 = vmax.f32 %v1618_v32, 0.0 }
 0x382   : > { %v1619_v36 = vadd.f32 %v2014_v26, %v1612_v34  ;;  %v1622_v38 = vadd.f32 %v1620_v35, %v2478_v8  ;;  %v1782_v8 = vld [vmem:[#allocation2 + $0x70] sm:$0xff] }
 0x383   : > { %2214 = vmatpush3.msra.mxu0 %v1782_v8 }
 0x384   : > { %v1621_v37 = vmax.f32 %v1619_v36, 0.0  ;;  %v1624_v41 = vmax.f32 %v1622_v38, 0.0  ;;  %2215 = vmatprep.subr.mxu0 %v2286_v62 }
 0x386   : > { %v1623_v39 = vadd.f32 %v1621_v37, %v2488_v10  ;;  %v1703_v44 = vrot.slane %v1624_v41, 7  ;;  %v1781_v10 = vld [vmem:[#allocation2 + $0x68] sm:$0xff] }
 0x387   : > { %2216 = vmatpush3.msra.mxu0 %v1781_v10 }
 0x388   : > { %v1625_v40 = vmax.f32 %v1623_v39, 0.0 }
 0x38a   : > { %v1629_v42 = vrot.slane %v1625_v40, 7 }
 0x38c   : > { %2202 = vmatmul.mubr.msk.f32.vlgmr.msra.gmra.mxu1 %vm591_vm8, %v1629_v42 }
 0x38d   : > { %2205 = vmatpush3.msra.mxu1 %v1626_v43  ;;  %2206 = vmatprep.mubr.msk.f32.mxu1 %vm2287_vm12, %v2286_v62  ;;  %v1869_v62 = vld [vmem:[%s2578_s2 + $0x8] sm:$0x1] }
 0x390   : > { %2207 = vmatmul.mubr.msk.f32.vlgmr.msra.gmra.mxu1 %vm591_vm8, %v1703_v44 }
 0x44c   : > { %v1698_v46 = vpop.f32.mrf.mxu1 }
 0x44e   : > { %v2203_v47 = vpop.f32.mrf.mxu1 }
 0x450   : > { %v1772_v48 = vpop.f32.mrf.mxu1 }
 0x451   : > { %v1773_v50 = vadd.f32 %v1772_v48, %v1698_v46 }
 0x452   : > { %v2208_v51 = vpop.f32.mrf.mxu1 }
 0x453   : > { %v1777_v52 = vadd.f32 %v1776_v49, %v1773_v50 }
 0x455   : > { %vm1778_vm13 = vcmp.gt.f32.partialorder %v1777_v52, 0.0  ;;  %v1779_v53 = vmul.f32 0.01, %v1777_v52 }
 0x457   : > { %v1780_v54 = vsel %vm1778_vm13, %v1777_v52, %v1779_v53 }
 0x458   : > { %2218 = vmatmul.mubr.msk.f32.vlgmr.msra.gmra.mxu0 %vm1786_vm14, %v1780_v54 }
 0x518   : > { %v1856_v56 = vpop.f32.mrf.mxu0 }
 0x519   : > { %v1857_v57 = vadd.f32 %v1856_v56, %v1785_v55 }
 0x51a   : > { %v2219_v58 = vpop.f32.mrf.mxu0 }
 0x51b   : > { %v1861_v59 = vmul.f32 0.01, %v1857_v57  ;;  %vm1860_vm15 = vcmp.gt.f32.partialorder %v1857_v57, 0.0 }
 0x51d   : > { %v1862_v20 = vsel %vm1860_vm15, %v1857_v57, %v1861_v59 }
 0x51e   : > { %v1864_v61 = vmul.f32 %v1863_v60, %v1862_v20 }
 0x520   : > { %v1866_v25 = vsel %vm1865_vm0, %v1864_v61, 0.0 }
 0x521   : > { %1867 = vadd.xlane.f32.xlu0 %v1866_v25 }
 0x5aa   : > { %v1868_v63 = vpop.xlane.xlu0 %1867 }
 0x5ab   : > { %v1870_v0 = vadd.f32 %v1869_v62, %v1868_v63 }
 0x5ad   : > { %vm1871_vm1 = vcmp.gt.f32.partialorder %v1870_v0, 0.0  ;;  %v1872_v3 = vmul.f32 0.01, %v1870_v0 }
 0x5af   : > { %v1873_v4 = vsel %vm1871_vm1, %v1870_v0, %v1872_v3 }
 0x5b0   : > { %2220 = vpush %v1873_v4 }
 0x5e1   : > { %s2221_s23 = spop %2220 }
 0x5e2   : > { %v1876_v2 = vstv %s2221_s23 }
 0x5e3   : > { %1878 = vst [vmem:[%s183_s22] sm:$0xff] %v1876_v2 }
 0x5e4 PF: > { %s14_s12 = sadd.s32 1, %s2281_s12  }
 0x5e5   : > { %p11_p1 = scmp.ge.s32.totalorder %s14_s12, 4  }
 0x5e7   :  { %13 = sbr.rel (!%p11_p1) target bundleno = 1 (0x1), region = 67 }
 0x5ec   :  { %1898 = vsyncpa [#allocation3], 1 }
 0x5ed   :  { %1900 = vsyncpa [#allocation3 + $0x1], 1 }

</bundles_post_ra>
